<compile_context>
chip_gen: v5e
topology: v5e:2x2
jax: 0.10.0
libtpu: 0.0.40
codegen_flags: <defaults>
</compile_context>

<pallas_src>
import functools

import jax
import jax.numpy as jnp
from jax.experimental import pallas as pl
from jax.experimental.pallas import tpu as pltpu


# --------------------------------------------------------------------------- #
# Helpers
# --------------------------------------------------------------------------- #
def _default_vmem_limit_bytes():
    """Platform-aware scoped-VMEM budget (v5e/v6e: ~96 MiB, v7x: ~48 MiB)."""
    try:
        cap = getattr(pltpu.get_tpu_info(), "vmem_capacity_bytes", None)
        if cap:
            return int(cap) * 3 // 4
    except Exception:
        pass
    try:
        kind = jax.devices()[0].device_kind.lower()
        if "v5" in kind or "v6" in kind:
            return 96 * 1024 * 1024
    except Exception:
        pass
    return 48 * 1024 * 1024  # conservative default: safe on v7x's 64 MiB VMEM


def _pick_lane_tile(hw, rows, itemsize, budget_bytes, max_lanes=8192):
    """Multiple-of-128 lane tile so one (rows, tile) block fits `budget_bytes`.

    Does NOT require the tile to divide hw -- callers use a cdiv grid with a
    masked / discarded tail block instead.
    """
    hw_pad = ((hw + 127) // 128) * 128
    by_budget = (budget_bytes // max(rows * itemsize, 1)) // 128 * 128
    return int(min(hw_pad, max(by_budget, 128), max_lanes))


# --------------------------------------------------------------------------- #
# Fused single-pass kernel: pool + excite + scale for one batch element.
# --------------------------------------------------------------------------- #
def _fused_kernel(x_ref, w1t_ref, w2t_ref, o_ref, *, inv_hw):
    # x_ref:   (1, C, HW)   native dtype
    # w1t_ref: (C, CR_PAD)  f32  (= W1.T zero-padded on the bottleneck dim)
    # w2t_ref: (CR_PAD, C)  f32  (= W2.T zero-padded on the bottleneck dim)
    # o_ref:   (1, C, HW)   native dtype
    x = x_ref[...]
    # Global average pool over HW, accumulated in f32.
    y = jnp.sum(x, axis=-1, dtype=jnp.float32) * inv_hw          # (1, C)
    # Pad M to 8 sublanes so the MXU matmuls are well-formed; rows are identical.
    y8 = jnp.broadcast_to(y, (8, y.shape[-1]))                    # (8, C)
    h = jnp.maximum(
        jnp.dot(y8, w1t_ref[...], preferred_element_type=jnp.float32), 0.0)
    s = jnp.dot(h, w2t_ref[...], preferred_element_type=jnp.float32)  # (8, C)
    w = jax.nn.sigmoid(s[0:1, :]).astype(o_ref.dtype)              # (1, C)
    o_ref[...] = x * w[:, :, None]


# --------------------------------------------------------------------------- #
# Fallback pass 1: streaming global-sum pooling (per batch element).
# --------------------------------------------------------------------------- #
def _pool_kernel(x_ref, sum_ref, acc_ref, *, hw_tile, hw_total, needs_mask):
    # x_ref:   (1, C, hw_tile) native dtype
    # sum_ref: (1, C, 1)       f32 per-(b, c) spatial sum
    # acc_ref: (1, C, 128)     f32 VMEM scratch (VPU accumulator)
    hi = pl.program_id(1)

    @pl.when(hi == 0)
    def _init():
        acc_ref[...] = jnp.zeros_like(acc_ref)

    acc = acc_ref[...]
    base = hi * hw_tile
    if needs_mask:
        lane = jax.lax.broadcasted_iota(jnp.int32, acc_ref.shape, 2)  # (1, C, 128)
    for ci in range(hw_tile // 128):
        chunk = x_ref[:, :, ci * 128:(ci + 1) * 128].astype(jnp.float32)
        if needs_mask:
            chunk = jnp.where(base + ci * 128 + lane < hw_total, chunk, 0.0)
        acc = acc + chunk            # elementwise: stays on the VPU
    acc_ref[...] = acc

    @pl.when(hi == pl.num_programs(1) - 1)
    def _finalize():
        # Single 128 -> 1 cross-lane (XLU) reduce, only once per batch element.
        sum_ref[...] = jnp.sum(acc_ref[...], axis=-1, keepdims=True)


# --------------------------------------------------------------------------- #
# Fallback pass 2: broadcast per-channel scale.
# --------------------------------------------------------------------------- #
def _scale_kernel(x_ref, w_ref, o_ref):
    # x_ref: (1, C, hw_tile) native dtype; w_ref: (1, C, 1) already in x.dtype.
    o_ref[...] = x_ref[...] * w_ref[...]


# --------------------------------------------------------------------------- #
# Wrapper
# --------------------------------------------------------------------------- #
def band_weight_generator(x_nchw, w1, w2, *, vmem_limit_bytes=None,
                          force_two_pass=False, donate_x=False):
    """x_nchw: (B, C, H, W). w1: (C//r, C), w2: (C, C//r) -- nn.Linear(bias=False).weight."""
    B, C, H, W = x_nchw.shape
    HW = H * W
    Cr = w1.shape[0]
    assert w1.shape == (Cr, C) and w2.shape == (C, Cr)

    if vmem_limit_bytes is None:
        vmem_limit_bytes = _default_vmem_limit_bytes()

    x = x_nchw.reshape(B, C, HW)
    itemsize = jnp.dtype(x.dtype).itemsize
    slab_bytes = C * HW * itemsize

    # Zero-pad the bottleneck dim (C//r, often 2..32) up to 128 so the in-kernel
    # matmuls are lane-dense.  Exact: padded columns of W1.T are zero -> relu(0)=0
    # -> padded rows of W2.T contribute nothing.
    cr_pad = ((Cr + 127) // 128) * 128
    weight_bytes = 2 * C * cr_pad * 4

    aliases = {0: 0} if donate_x else {}

    # ------------------------------------------------------------------ #
    # Fused single-pass path: one (C, HW) slab per grid step.
    # 2 in + 2 out double-buffered slabs + 1 slab headroom + weights must fit.
    # ------------------------------------------------------------------ #
    fused_fits = (5 * slab_bytes + weight_bytes + (2 << 20)) <= vmem_limit_bytes
    if fused_fits and not force_two_pass:
        w1t = jnp.zeros((C, cr_pad), jnp.float32).at[:, :Cr].set(
            w1.astype(jnp.float32).T)
        w2t = jnp.zeros((cr_pad, C), jnp.float32).at[:Cr, :].set(
            w2.astype(jnp.float32).T)

        out = pl.pallas_call(
            functools.partial(_fused_kernel, inv_hw=1.0 / HW),
            out_shape=jax.ShapeDtypeStruct((B, C, HW), x.dtype),
            grid_spec=pltpu.PrefetchScalarGridSpec(
                num_scalar_prefetch=0,
                grid=(B,),
                in_specs=[
                    pl.BlockSpec((1, C, HW), lambda b: (b, 0, 0)),
                    pl.BlockSpec((C, cr_pad), lambda b: (0, 0)),
                    pl.BlockSpec((cr_pad, C), lambda b: (0, 0)),
                ],
                out_specs=pl.BlockSpec((1, C, HW), lambda b: (b, 0, 0)),
            ),
            compiler_params=pltpu.CompilerParams(
                dimension_semantics=("parallel",),
                vmem_limit_bytes=vmem_limit_bytes),
            input_output_aliases=aliases,
        )(x, w1t, w2t)
        return out.reshape(B, C, H, W)

    # ------------------------------------------------------------------ #
    # Fallback: streaming two-pass path.
    # ------------------------------------------------------------------ #
    # ---- Pass 1: per-(b, c) spatial sums, tiled over (B, HW) ----
    resident = C * 128 * 4 + C * 4 + (1 << 20)     # scratch + out block + slack
    pool_budget = max(vmem_limit_bytes - resident, 1 << 20) // 3
    hw_tile_pool = _pick_lane_tile(HW, C, itemsize, pool_budget)
    n_hw_pool = pl.cdiv(HW, hw_tile_pool)
    needs_mask = (HW % hw_tile_pool) != 0

    pooled = pl.pallas_call(
        functools.partial(_pool_kernel, hw_tile=hw_tile_pool, hw_total=HW,
                          needs_mask=needs_mask),
        out_shape=jax.ShapeDtypeStruct((B, C, 1), jnp.float32),
        grid_spec=pltpu.PrefetchScalarGridSpec(
            num_scalar_prefetch=0,
            grid=(B, n_hw_pool),
            in_specs=[pl.BlockSpec((1, C, hw_tile_pool), lambda b, hi: (b, 0, hi))],
            out_specs=pl.BlockSpec((1, C, 1), lambda b, hi: (b, 0, 0)),
            scratch_shapes=[pltpu.VMEM((1, C, 128), jnp.float32)],
        ),
        compiler_params=pltpu.CompilerParams(
            dimension_semantics=("parallel", "arbitrary"),
            vmem_limit_bytes=vmem_limit_bytes),
    )(x)

    # ---- Excitation on the (B, C) pooled means: negligible FLOPs, plain XLA ----
    y = pooled.reshape(B, C) * (1.0 / HW)
    h = jnp.maximum(y @ w1.astype(jnp.float32).T, 0.0)
    w_bc = jax.nn.sigmoid(h @ w2.astype(jnp.float32).T)            # (B, C) f32
    w_bc1 = w_bc.astype(x.dtype).reshape(B, C, 1)                  # pre-cast scale

    # ---- Pass 2: memory-bound broadcast scale, tiled over (B, HW) ----
    scale_budget = max(vmem_limit_bytes - (1 << 20), 1 << 20) // 5
    hw_tile = _pick_lane_tile(HW, C, itemsize, scale_budget)
    n_hw = pl.cdiv(HW, hw_tile)

    out = pl.pallas_call(
        _scale_kernel,
        out_shape=jax.ShapeDtypeStruct((B, C, HW), x.dtype),
        grid_spec=pltpu.PrefetchScalarGridSpec(
            num_scalar_prefetch=0,
            grid=(B, n_hw),
            in_specs=[
                pl.BlockSpec((1, C, hw_tile), lambda b, hi: (b, 0, hi)),
                pl.BlockSpec((1, C, 1), lambda b, hi: (b, 0, 0)),
            ],
            out_specs=pl.BlockSpec((1, C, hw_tile), lambda b, hi: (b, 0, hi)),
        ),
        compiler_params=pltpu.CompilerParams(
            dimension_semantics=("parallel", "parallel"),
            vmem_limit_bytes=vmem_limit_bytes),
        input_output_aliases=aliases,
    )(x, w_bc1)

    return out.reshape(B, C, H, W)


# --------------------------------------------------------------------------- #
# Reference + test
# --------------------------------------------------------------------------- #
def _reference(x_nchw, w1, w2):
    y = jnp.mean(x_nchw, axis=(2, 3))                    # (B, C)
    h = jnp.maximum(y @ w1.T, 0.0)                       # (B, C//r)
    w = jax.nn.sigmoid(h @ w2.T)                         # (B, C)
    return x_nchw * w[:, :, None, None]


if __name__ == "__main__":
    # Small shapes consistent with the module (in_channels divisible by reduction=16).
    B, C, reduction = 2, 32, 16
    Cr = C // reduction

    key = jax.random.PRNGKey(0)
    kx, k1, k2, kx2 = jax.random.split(key, 4)
    # Shapes match nn.Linear(..., bias=False).weight.
    w1 = jax.random.normal(k1, (Cr, C), dtype=jnp.float32) * 0.1   # Linear(C -> C//r)
    w2 = jax.random.normal(k2, (C, Cr), dtype=jnp.float32) * 0.1   # Linear(C//r -> C)

    # Case 1: fused single-pass path (slab fits VMEM).
    x = jax.random.normal(kx, (B, C, 16, 16), dtype=jnp.float32)
    out = jax.block_until_ready(band_weight_generator(x, w1, w2))
    ref = _reference(x, w1, w2)
    assert out.shape == x.shape
    assert jnp.allclose(out, ref, atol=1e-4, rtol=1e-4)

    # Case 2: streaming two-pass fallback on the same data.
    out2 = jax.block_until_ready(
        band_weight_generator(x, w1, w2, force_two_pass=True))
    assert jnp.allclose(out2, ref, atol=1e-4, rtol=1e-4)

    # Case 3: H*W not a multiple of 128 (masked tail in the fallback path).
    x3 = jax.random.normal(kx2, (B, C, 10, 10), dtype=jnp.float32)
    ref3 = _reference(x3, w1, w2)
    out3 = jax.block_until_ready(
        band_weight_generator(x3, w1, w2, force_two_pass=True))
    assert jnp.allclose(out3, ref3, atol=1e-4, rtol=1e-4)

    # Case 4: odd spatial size through the fused path as well.
    out4 = jax.block_until_ready(band_weight_generator(x3, w1, w2))
    assert jnp.allclose(out4, ref3, atol=1e-4, rtol=1e-4)

    print("KERNEL_OK")
</pallas_src>

<mosaic_0001>
module attributes {stable_mosaic.version = 11 : i64} {
  func.func @_fused_kernel(%arg0: i32, %arg1: memref<1x32x256xf32, #tpu.memory_space<vmem>>, %arg2: memref<32x128xf32, #tpu.memory_space<vmem>>, %arg3: memref<128x32xf32, #tpu.memory_space<vmem>>, %arg4: memref<1x32x256xf32, #tpu.memory_space<vmem>>) attributes {dimension_semantics = [#tpu.dimension_semantics<parallel>], iteration_bounds = array<i64: 2>, scalar_prefetch = 0 : i64, scratch_operands = 0 : i64, tpu.core_type = #tpu.core_type<tc>, window_params = [{transform_indices = @transform_0, window_bounds = array<i64: 1, 32, 256>}, {pipeline_mode = #tpu.pipeline_mode<synchronous>, transform_indices = @transform_1, window_bounds = array<i64: 32, 128>}, {pipeline_mode = #tpu.pipeline_mode<synchronous>, transform_indices = @transform_2, window_bounds = array<i64: 128, 32>}, {transform_indices = @transform_3, window_bounds = array<i64: 1, 32, 256>}]} {
    %c0 = arith.constant 0 : index
    %c0_0 = arith.constant 0 : index
    %c0_1 = arith.constant 0 : index
    %0 = vector.load %arg1[%c0, %c0_0, %c0_1] : memref<1x32x256xf32, #tpu.memory_space<vmem>>, vector<1x32x256xf32>
    %cst = arith.constant dense<0.000000e+00> : vector<1x32xf32>
    %1 = vector.multi_reduction <add>, %0, %cst [2] : vector<1x32x256xf32> to vector<1x32xf32>
    %cst_2 = arith.constant 3.906250e-03 : f32
    %2 = vector.broadcast %cst_2 : f32 to vector<1x32xf32>
    %3 = arith.mulf %1, %2 : vector<1x32xf32>
    %4 = vector.shape_cast %3 : vector<1x32xf32> to vector<1x32xf32>
    %5 = vector.broadcast %4 : vector<1x32xf32> to vector<8x32xf32>
    %c0_3 = arith.constant 0 : index
    %c0_4 = arith.constant 0 : index
    %6 = vector.load %arg2[%c0_3, %c0_4] : memref<32x128xf32, #tpu.memory_space<vmem>>, vector<32x128xf32>
    %cst_5 = arith.constant dense<0.000000e+00> : vector<8x128xf32>
    %7 = tpu.matmul %5, %6, %cst_5 {dimension_numbers = #tpu.dot_dimension_numbers<[1], [0], [0], [1], [0, 0, 1, 1], [], []>} : vector<8x32xf32>, vector<32x128xf32>, vector<8x128xf32> -> vector<8x128xf32>
    %cst_6 = arith.constant 0.000000e+00 : f32
    %8 = vector.broadcast %cst_6 : f32 to vector<8x128xf32>
    %9 = arith.maximumf %7, %8 : vector<8x128xf32>
    %c0_7 = arith.constant 0 : index
    %c0_8 = arith.constant 0 : index
    %10 = vector.load %arg3[%c0_7, %c0_8] : memref<128x32xf32, #tpu.memory_space<vmem>>, vector<128x32xf32>
    %cst_9 = arith.constant dense<0.000000e+00> : vector<8x32xf32>
    %11 = tpu.matmul %9, %10, %cst_9 {dimension_numbers = #tpu.dot_dimension_numbers<[1], [0], [0], [1], [0, 0, 1, 1], [], []>} : vector<8x128xf32>, vector<128x32xf32>, vector<8x32xf32> -> vector<8x32xf32>
    %12 = vector.extract_strided_slice %11 {offsets = [0, 0], sizes = [1, 32], strides = [1, 1]} : vector<8x32xf32> to vector<1x32xf32>
    %13 = arith.negf %12 : vector<1x32xf32>
    %14 = math.exp %13 : vector<1x32xf32>
    %cst_10 = arith.constant 1.000000e+00 : f32
    %15 = vector.broadcast %cst_10 : f32 to vector<1x32xf32>
    %16 = arith.addf %15, %14 : vector<1x32xf32>
    %17 = arith.divf %15, %16 : vector<1x32xf32>
    %18 = vector.shape_cast %17 : vector<1x32xf32> to vector<1x32x1xf32>
    %19 = vector.broadcast %18 : vector<1x32x1xf32> to vector<1x32x256xf32>
    %20 = arith.mulf %0, %19 : vector<1x32x256xf32>
    %c0_11 = arith.constant 0 : index
    %c0_12 = arith.constant 0 : index
    %c0_13 = arith.constant 0 : index
    %21 = vector.load %arg4[%c0_11, %c0_12, %c0_13] : memref<1x32x256xf32, #tpu.memory_space<vmem>>, vector<1x32x256xf32>
    tpu.vector_store %arg4[%c0_11, %c0_12, %c0_13], %20 {strides = array<i32>} : memref<1x32x256xf32, #tpu.memory_space<vmem>>, vector<1x32x256xf32>,
    return
  }
  func.func @transform_0(%arg0: i32) -> (i32, i32, i32) {
    %c0_i32 = arith.constant 0 : i32
    %c0_i32_0 = arith.constant 0 : i32
    %c0_i32_1 = arith.constant 0 : i32
    return %arg0, %c0_i32, %c0_i32_0 : i32, i32, i32
  }
  func.func @transform_1(%arg0: i32) -> (i32, i32) {
    %c0_i32 = arith.constant 0 : i32
    %c0_i32_0 = arith.constant 0 : i32
    %c0_i32_1 = arith.constant 0 : i32
    return %c0_i32, %c0_i32_0 : i32, i32
  }
  func.func @transform_2(%arg0: i32) -> (i32, i32) {
    %c0_i32 = arith.constant 0 : i32
    %c0_i32_0 = arith.constant 0 : i32
    %c0_i32_1 = arith.constant 0 : i32
    return %c0_i32, %c0_i32_0 : i32, i32
  }
  func.func @transform_3(%arg0: i32) -> (i32, i32, i32) {
    %c0_i32 = arith.constant 0 : i32
    %c0_i32_0 = arith.constant 0 : i32
    %c0_i32_1 = arith.constant 0 : i32
    return %arg0, %c0_i32, %c0_i32_0 : i32, i32, i32
  }
}

</mosaic_0001>

<bundles_post_ra>
// kernel: tpu_custom_call.1
= control target key start
LH: loop header
LB: loop body
LE: loop exit
PB: predicated region body
PF: predicated region fallthrough
CT: control target
= control target key end

     0   :  { %8 = vsyncpa [#allocation3], 0  ;;  %s755_s0 = inlined_call_operand.vmem [shape: f32[2,32,256], index: 0, kind: input, shape index: {}]   ;;  %s756_s1 = inlined_call_operand.vmem [shape: f32[32,128], index: 1, kind: input, shape index: {}]   ;;  %s757_s2 = inlined_call_operand.vmem [shape: f32[128,32], index: 2, kind: input, shape index: {}]   ;;  %s758_s3 = inlined_call_operand.hbm [shape: f32[2,32,256], index: 3, kind: output, shape index: {}]  }
   0x1   :  { %10 = vsyncpa [#allocation3 + $0x1], 0  ;;  %s578_s12 = smov 0   ;;  %s580_s13 = smov 0  }
   0x2   :  { %s582_s14 = smov 0   ;;  %s584_s15 = smov 0  }
   0x3 LB: > { %s599_s16 = sadd.s32 4294967295, %s554_s15   ;;  %s426_s17 = sadd.s32 4294967294, %s554_s15   ;;  %s554_s15 = sphi %s584_s15, %s764_s15   ;;  %s550_s14 = sphi %s582_s14, %s763_s14   ;;  %s546_s13 = sphi %s580_s13, %s762_s13   ;;  %s542_s12 = sphi %s578_s12, %s761_s12  }
   0x4   : > { %s603_s18 = sadd.s32 1, %s554_s15   ;;  %s91_s19 = sadd.s32 1, %s550_s14 }
   0x5   : > { %s88_s20 = ssub.s32 %s554_s15, %s603_s18  ;;  %p101_p0 = scmp.ne.s32.totalorder %s550_s14, %s546_s13 }
   0x6   : > { %p89_p1 = scmp.eq.s32.totalorder %s88_s20, 0  ;;  %p102_p2 = scmp.eq.s32.totalorder %s599_s16, 1 }
   0x7   : > { %p107_p3 = scmp.ne.s32.totalorder %s546_s13, %s542_s12  ;;  %p108_p4 = scmp.eq.s32.totalorder %s426_s17, 1 }
   0x8   : > { %s614_s21 = scalar_select %p89_p1, %s550_s14, %s91_s19  }
   0x9   : > { %p616_p5 = por %p102_p2, %p101_p0  ;;  %p620_p6 = por %p108_p4, %p107_p3 }
   0xa   : > { %p429_p7 = scmp.ge.s32.totalorder %s554_s15, 1  ;;  %p140_p8 = scmp.lt.s32.totalorder %s554_s15, 3 }
   0xc   : > { %p141_p9 = pnand %p429_p7, %p140_p8 }
   0xd   : > { %p164_p10 = scmp.lt.s32.totalorder (!%p141_p9), %s599_s16, 1  ;;  %s161_s6 = sand.u32 (!%p141_p9), 1, %s546_s13  }
   0xe   : > { %144 = sbr.rel (%p141_p9) target bundleno = 565 (0x235), region = 32  ;;  %s430_s7 = sshll.u32 (!%p141_p9), %s161_s6, 6 }
   0xf   : > { %s163_s8 = scalar_lea.vmem (!%p141_p9), [#allocation2], %s430_s7  ;;  %s441_s9 = sshll.u32 (!%p141_p9), %s599_s16, 6 }
  0x10   : > { %s360_s17 = scalar_lea.hbm (!%p141_p9), %s758_s3, %s441_s9  ;;  %s361_s19 = sshll.u32 (!%p141_p9), %s163_s8, 4  ;;  %s362_s19 = int_to_ptr.vmem [resolvable:$true] %s361_s19 }
  0x11   : > { %s363_s20 = sshll.u32 (!%p141_p9), %s360_s17, 4  ;;  %s364_s20 = int_to_ptr.hbm [resolvable:$true] %s363_s20 }
  0x13   : > { %s165_s24 = scalar_select %p164_p10, %s599_s16, 1  ;;  %v196_v12 = vld [vmem:[%s756_s1 + $0x18] sm:$0xff]  ;;  %v195_v13 = vld [vmem:[%s756_s1 + $0x10] sm:$0xff]  ;;  %v194_v14 = vld [vmem:[%s756_s1 + $0x8] sm:$0xff]  ;;  %v201_v25 = vlaneseq  ;;  %vm206_vm0 = vcmask 130112   ;;  %vm210_vm1 = vcmask 195712  }
  0x14   : > { %243 = vmatpush.msra.mxu0 %v196_v12  ;;  %v193_v15 = vld [vmem:[%s756_s1] sm:$0xff]  ;;  %v267_v16 = vld [vmem:[%s757_s2 + $0x78] sm:$0xff]  ;;  %v266_v17 = vld [vmem:[%s757_s2 + $0x70] sm:$0xff]  ;;  %vm214_vm2 = vcmask 261312   ;;  %vm228_vm3 = vcmask 261120   ;;  %s349_s16 = scalar_lea.sflag [#allocation3], %s161_s6 }
  0x15   : > { %s440_s25 = sshll.u32 %s165_s24, 6  ;;  %268 = vmatpush.msra.mxu1 %v267_v16  ;;  %v265_v18 = vld [vmem:[%s757_s2 + $0x68] sm:$0xff]  ;;  %v264_v19 = vld [vmem:[%s757_s2 + $0x60] sm:$0xff]  ;;  %v263_v20 = vld [vmem:[%s757_s2 + $0x58] sm:$0xff]  ;;  %v202_v30 = vand.u32 127, %v201_v25  ;;  %v309_v54 = vshrl.u32 %v201_v25, 7 }
  0x16   : > { %s168_s28 = scalar_lea.vmem %s755_s0, %s440_s25  ;;  %244 = vmatpush.msra.mxu0 %v195_v13  ;;  %v262_v21 = vld [vmem:[%s757_s2 + $0x50] sm:$0xff]  ;;  %v261_v22 = vld [vmem:[%s757_s2 + $0x48] sm:$0xff]  ;;  %v260_v23 = vld [vmem:[%s757_s2 + $0x40] sm:$0xff]  ;;  %s506_s24 = sshra.s32 %s364_s20, 4  ;;  %s507_s24 = int_to_ptr.hbm [resolvable:$true] %s506_s24 }
  0x17   : > { %v631_v0 = vld [vmem:[%s168_s28] sm:$0xff]  ;;  %v633_v1 = vld [vmem:[%s168_s28 + $0x8] sm:$0xff]  ;;  %v643_v6 = vld [vmem:[%s168_s28 + $0x10] sm:$0xff]  ;;  %269 = vmatpush.msra.mxu1 %v266_v17  ;;  %v204_v34 = vadd.s32 4294967288, %v202_v30  ;;  %v208_v35 = vadd.s32 4294967280, %v202_v30  ;;  %v212_v38 = vadd.s32 4294967272, %v202_v30  ;;  %483 = vset.pattern.permute.xlu2 %v309_v54  ;;  %p513_p0 = scmp.lt.s32.totalorder %s507_s24, %s758_s3 }
  0x18   : > { %v635_v2 = vld [vmem:[%s168_s28 + $0x20] sm:$0xff]  ;;  %v177_v3 = vadd.f32 %v633_v1, %v631_v0  ;;  %v639_v4 = vld [vmem:[%s168_s28 + $0x28] sm:$0xff]  ;;  %v645_v7 = vld [vmem:[%s168_s28 + $0x18] sm:$0xff]  ;;  %245 = vmatpush.msra.mxu0 %v194_v14  ;;  %v328_v55 = vadd.s32 24, %v309_v54  ;;  %v322_v56 = vadd.s32 16, %v309_v54  ;;  %v316_v16 = vadd.s32 8, %v309_v54 }
  0x19   : > { %v183_v5 = vadd.f32 %v639_v4, %v635_v2  ;;  %v647_v8 = vld [vmem:[%s168_s28 + $0x30] sm:$0xff]  ;;  %v649_v9 = vld [vmem:[%s168_s28 + $0x38] sm:$0xff]  ;;  %v180_v10 = vadd.f32 %v645_v7, %v643_v6  ;;  %270 = vmatpush.msra.mxu1 %v265_v18  ;;  %v257_v29 = vld [vmem:[%s757_s2 + $0x28] sm:$0xff]  ;;  %s508_s25 = scalar_lea.hbm %s507_s24, 64  ;;  %s512_s28 = scalar_lea.hbm %s758_s3, 128 }
  0x1a   : > { %178 = vadd.xlane.f32.xlu0 %v177_v3  ;;  %v186_v11 = vadd.f32 %v649_v9, %v647_v8  ;;  %246 = vmatpush.msra.mxu0 %v193_v15  ;;  %v259_v24 = vld [vmem:[%s757_s2 + $0x38] sm:$0xff]  ;;  %v258_v27 = vld [vmem:[%s757_s2 + $0x30] sm:$0xff]  ;;  %v256_v31 = vld [vmem:[%s757_s2 + $0x20] sm:$0xff]  ;;  %p509_p11 = scmp.ne.s32.totalorder %s507_s24, %s508_s25  ;;  %p514_p1 = scmp.lt.s32.totalorder %s512_s28, %s508_s25 }
  0x1b   : > { %184 = vadd.xlane.f32.xlu1 %v183_v5  ;;  %271 = vmatpush.msra.mxu1 %v264_v19  ;;  %v255_v32 = vld [vmem:[%s757_s2 + $0x18] sm:$0xff]  ;;  %v254_v39 = vld [vmem:[%s757_s2 + $0x10] sm:$0xff]  ;;  %v253_v50 = vld [vmem:[%s757_s2 + $0x8] sm:$0xff] }
  0x1c   : > { %v252_v51 = vld [vmem:[%s757_s2] sm:$0xff]  ;;  %486 = vset.pattern.permute.xlu1 %v328_v55  ;;  %485 = vset.pattern.permute.xlu0 %v322_v56  ;;  %p510_p12 = pnand %p509_p11, %p616_p5  ;;  %p515_p2 = por %p514_p1, %p513_p0 }
  0x1d   : > { %272 = vmatpush.msra.mxu1 %v263_v20 }
  0x1e   : > { %p511_p13 = pneg %p510_p12 }
  0x1f   : > { %273 = vmatpush.msra.mxu1 %v262_v21 }
  0x20   : > { %p516_p3 = pnand %p515_p2, %p511_p13 }
  0x21   : > { %274 = vmatpush.msra.mxu1 %v261_v22 }
  0x22   : > { %181 = vadd.xlane.f32.xlu0 %v180_v10 }
  0x23   : > { %187 = vadd.xlane.f32.xlu1 %v186_v11  ;;  %275 = vmatpush.msra.mxu1 %v260_v23 }
  0x25   : > { %276 = vmatpush.msra.mxu1 %v259_v24 }
  0x27   : > { %277 = vmatpush.msra.mxu1 %v258_v27 }
  0x29   : > { %278 = vmatpush.msra.mxu1 %v257_v29 }
  0x2b   : > { %279 = vmatpush.msra.mxu1 %v256_v31 }
  0x2d   : > { %280 = vmatpush.msra.mxu1 %v255_v32 }
  0x2f   : > { %281 = vmatpush.msra.mxu1 %v254_v39 }
  0x31   : > { %282 = vmatpush.msra.mxu1 %v253_v50 }
  0x33   : > { %283 = vmatpush.msra.mxu1 %v252_v51 }
  0x8d   : > { %v179_v26 = vpop.xlane.xlu0 %178 }
  0x8e   : > { %v185_v28 = vpop.xlane.xlu1 %184  ;;  %v189_v33 = vmul.f32 0.00390625, %v179_v26 }
  0x8f   : > { %v191_v36 = vmul.f32 0.00390625, %v185_v28 }
  0x90   : > { %v203_v43 = vperm.slane %v189_v33, %v202_v30 }
  0x91   : > { %v209_v45 = vperm.slane %v191_v36, %v208_v35 }
  0x95   : > { %v182_v37 = vpop.xlane.xlu0 %181 }
  0x96   : > { %v190_v40 = vmul.f32 0.00390625, %v182_v37  ;;  %v188_v41 = vpop.xlane.xlu1 %187 }
  0x97   : > { %v192_v42 = vmul.f32 0.00390625, %v188_v41 }
  0x98   : > { %v205_v44 = vperm.slane %v190_v40, %v204_v34 }
  0x99   : > { %v213_v46 = vperm.slane %v192_v42, %v212_v38 }
  0x9a   : > { %v207_v47 = vsel %vm206_vm0, %v205_v44, %v203_v43 }
  0x9b   : > { %v211_v48 = vsel %vm210_vm1, %v209_v45, %v207_v47 }
  0x9c   : > { %v215_v49 = vsel %vm214_vm2, %v213_v46, %v211_v48 }
  0x9d   : > { %433 = vmatmul.msk.f32.vlgmr.msra.gmra.mxu0 %vm228_vm3, %v215_v49 }
 0x11a   : > { %v248_v52 = vpop.f32.mrf.mxu0 }
 0x11b   : > { %v251_v53 = vmax.f32 %v248_v52, 0.0 }
 0x11d   : > { %284 = vmatmul.f32.vlgmr.msra.gmra.mxu1 %v251_v53 }
 0x19a   : > { %v285_v57 = vpop.f32.mrf.mxu1 }
 0x19b   : > { %v434_v58 = vmul.f32 -1.442695, %v285_v57 }
 0x19d   : > { %488 = vpow2.f32 %v434_v58 }
 0x1a3   : > { %v489_v59 = vpop.eup %488 }
 0x1a4   : > { %v291_v60 = vadd.f32 1.0, %v489_v59 }
 0x1a6   : > { %490 = vrcp.f32 %v291_v60  ;;  %v303_v3 = vand.u32 2147483648, %v291_v60  ;;  %v301_v10 = vand.u32 2147483647, %v291_v60  ;;  %vm297_vm5 = vweird.f32 %v291_v60 }
 0x1a8   : > { %v304_v12 = vor.u32 1.1754944e-38, %v303_v3  ;;  %vm302_vm7 = vcmp.eq.f32.partialorder %v301_v10, 8.507059e+37 }
 0x1ac   : > { %v491_v61 = vpop.eup %490 }
 0x1ad   : > { %v293_v62 = vmul.f32 %v491_v61, %v291_v60  ;;  %vm298_vm4 = vweird.f32 %v491_v61 }
 0x1ae   : > { %vm299_vm6 = vmor %vm297_vm5, %vm298_vm4 }
 0x1af   : > { %v294_v63 = vsub.f32 1.0, %v293_v62 }
 0x1b1   : > { %v295_v5 = vmul.f32 %v491_v61, %v294_v63 }
 0x1b3   : > { %v296_v11 = vadd.f32 %v491_v61, %v295_v5 }
 0x1b5   : > { %v300_v13 = vsel %vm299_vm6, %v491_v61, %v296_v11 }
 0x1b6   : > { %v305_v14 = vsel %vm302_vm7, %v304_v12, %v300_v13 }
 0x1b7   : > { %v307_v15 = vperm.slane %v305_v14, 0 }
 0x1b9   : > { %330 = vperm.xlu1 %486, %v307_v15   ;;  %324 = vperm.xlu0 %485, %v307_v15  }
 0x1ba   : > { %312 = vperm.xlu2 %483, %v307_v15  }
 0x1c1   : > { %487 = vset.pattern.permute.xlu0 %v328_v55 }
 0x1c2   : > { %484 = vset.pattern.permute.xlu2 %v316_v16 }
 0x1ca   : > { %318 = vperm.xlu2 %484, %v307_v15  }
 0x214   : > { %v313_v17 = vpop.permute.xlu2 %312 }
 0x215   : > { %v332_v18 = vmul.f32 %v313_v17, %v631_v0  ;;  %v333_v19 = vmul.f32 %v313_v17, %v633_v1 }
 0x217   : > { %340 = vst [vmem:[%s163_s8] sm:$0xff] %v332_v18 }
 0x218   : > { %341 = vst [vmem:[%s163_s8 + $0x8] sm:$0xff] %v333_v19 }
 0x224   : > { %v319_v20 = vpop.permute.xlu2 %318 }
 0x225   : > { %v334_v21 = vmul.f32 %v319_v20, %v643_v6  ;;  %v335_v22 = vmul.f32 %v319_v20, %v645_v7 }
 0x227   : > { %342 = vst [vmem:[%s163_s8 + $0x10] sm:$0xff] %v334_v21 }
 0x228   : > { %343 = vst [vmem:[%s163_s8 + $0x18] sm:$0xff] %v335_v22 }
 0x22b   : > { %v331_v23 = vpop.permute.xlu1 %330  ;;  %v325_v24 = vpop.permute.xlu0 %324 }
 0x22c   : > { %v338_v0 = vmul.f32 %v331_v23, %v647_v8  ;;  %v339_v1 = vmul.f32 %v331_v23, %v649_v9  ;;  %v336_v6 = vmul.f32 %v325_v24, %v635_v2  ;;  %v337_v7 = vmul.f32 %v325_v24, %v639_v4 }
 0x22e   : > { %346 = vst [vmem:[%s163_s8 + $0x30] sm:$0xff] %v338_v0 }
 0x22f   : > { %347 = vst [vmem:[%s163_s8 + $0x38] sm:$0xff] %v339_v1 }
 0x230   : > { %344 = vst [vmem:[%s163_s8 + $0x20] sm:$0xff] %v336_v6 }
 0x231   : > { %345 = vst [vmem:[%s163_s8 + $0x28] sm:$0xff] %v337_v7 }
 0x232   : > { %519 = shalt.err (!%p516_p3)
}
 0x233   : > { %s556_s4 = smov 256   ;;  %s557_s5 = smov 16  }
 0x234   : > { %442 = dma.vmem_to_hbm [thread:$0]  (%p616_p5), %s362_s19, 1024, %s364_s20, %s349_s16, %s556_s4, %s556_s4, %s557_s5  }
 0x235 PF: > { %p448_p4 = scmp.ge.s32.totalorder %s554_s15, 2  ;;  %s378_s6 = sand.u32 1, %s542_s12  }
 0x236   : > { %s379_s7 = scalar_lea.sflag [#allocation3], %s378_s6 }
 0x237   : > { %p445_p7 = pnand %p448_p4, %p620_p6 }
 0x239   : > { %p446_p8 = pneg %p445_p7 }
 0x23b   : > { %537 = dma.done.wait (%p446_p8), %s379_s7, 1024  }
 0x23c   : > { %539 = vsyncadd (%p446_p8), %s379_s7, 4294966272  ;;  %p13_p9 = scmp.ge.s32.totalorder %s603_s18, 4   ;;  %s761_s12 = smov %s546_s13 }
 0x23d   : > { %s762_s13 = smov %s550_s14  ;;  %s763_s14 = smov %s614_s21 }
 0x23e   : > { %s764_s15 = smov %s603_s18  ;;  %15 = sbr.rel (!%p13_p9) target bundleno = 3 (0x3), region = 67 }
 0x243   :  { %385 = vsyncpa [#allocation3], 1 }
 0x244   :  { %387 = vsyncpa [#allocation3 + $0x1], 1 }

</bundles_post_ra>
